<compile_context>
chip_gen: v6e
topology: v6e:2x2x1
jax: 0.10.0
libtpu: 0.0.40
codegen_flags: <defaults>
</compile_context>

<pallas_src>
import functools

import jax
import jax.numpy as jnp
from jax import lax
from jax.experimental import pallas as pl
from jax.experimental.pallas import tpu as pltpu


def _bottleneck_kernel(x_ref, w1_ref, b1_ref, w2_ref, b2_ref, w3_ref, b3_ref,
                       o_ref, pad_ref, patch_ref):
    """One batch element per grid step.

    x_ref    : (1, H, W, Cin)     input tile (NHWC, f32)
    w1_ref   : (Cin, width)       bn1-scaled 1x1 conv weight (bf16)
    w2_ref   : (9*width, width)   bn2-scaled 3x3 conv weight, im2col layout (bf16)
    w3_ref   : (width, Cout)      bn3-scaled 1x1 conv weight (bf16)
    b*_ref   : (1, C)             folded BatchNorm bias (f32)
    o_ref    : (1, H, W, Cout)
    pad_ref  : (H+2, W+2, width)  zero-padded conv2 input  (f32 VMEM scratch)
    patch_ref: (H, W, 9*width)    im2col patch slab        (f32 VMEM scratch)
    """
    _, H, W, Cin = x_ref.shape
    width = w1_ref.shape[1]
    Cout = w3_ref.shape[1]

    # ---- conv1 (1x1, bn1 scale folded into w1) + bias + relu ----------------
    x2d = x_ref[0].reshape(H * W, Cin)
    h1 = jnp.dot(x2d.astype(jnp.bfloat16), w1_ref[...],
                 preferred_element_type=jnp.float32)
    h1 = jnp.maximum(h1 + b1_ref[...], 0.0)                  # (H*W, width) f32

    # ---- conv2 (3x3, padding=1, stride=1) as one im2col matmul --------------
    # Clear only the 1-element halo border; the interior is overwritten below.
    # (Done every step so it stays correct if the batch axis is sharded across
    #  TensorCores with per-core scratch.)
    pad_ref[0:1, :, :] = jnp.zeros((1, W + 2, width), jnp.float32)
    pad_ref[H + 1:H + 2, :, :] = jnp.zeros((1, W + 2, width), jnp.float32)
    pad_ref[:, 0:1, :] = jnp.zeros((H + 2, 1, width), jnp.float32)
    pad_ref[:, W + 1:W + 2, :] = jnp.zeros((H + 2, 1, width), jnp.float32)
    pad_ref[1:H + 1, 1:W + 1, :] = h1.reshape(H, W, width)

    # Gather the 9 taps into the (H, W, 9*width) patch slab (one copy per tap,
    # no per-tap reshape), then one big MXU matmul.
    for dy in range(3):
        for dx in range(3):
            c0 = (dy * 3 + dx) * width
            patch_ref[:, :, c0:c0 + width] = pad_ref[dy:dy + H, dx:dx + W, :]
    patches = patch_ref[...].reshape(H * W, 9 * width)
    h2 = jnp.dot(patches.astype(jnp.bfloat16), w2_ref[...],
                 preferred_element_type=jnp.float32)
    h2 = jnp.maximum(h2 + b2_ref[...], 0.0)                  # (H*W, width) f32

    # ---- conv3 (1x1, bn3 scale folded into w3) + bias ------------------------
    h3 = jnp.dot(h2.astype(jnp.bfloat16), w3_ref[...],
                 preferred_element_type=jnp.float32)
    h3 = h3 + b3_ref[...]                                    # (H*W, Cout) f32

    # ---- residual add + relu (re-read x: keep its live range short) ---------
    out = jnp.maximum(h3 + x_ref[0].reshape(H * W, Cout), 0.0)
    o_ref[0] = out.reshape(H, W, Cout).astype(o_ref.dtype)


def _vmem_limit_bytes(H, W, Cin, Cout, width):
    """Explicit VMEM budget (v7x has 64 MiB physical; v5e/v6e have 128 MiB)."""
    io = 2 * H * W * (Cin + Cout) * 4                         # double-buffered in/out blocks
    scratch = ((H + 2) * (W + 2) * width + H * W * 9 * width) * 4
    weights = 2 * (Cin * width + 9 * width * width + width * Cout)
    est = io + scratch + weights + (4 << 20)                  # headroom for spills
    return int(max(32 << 20, min(est, 56 << 20)))


def bottleneck_forward(x_nchw, params):
    """x_nchw: (N, Cin, H, W) float32. Returns (N, Cout, H, W) float32."""
    w1, s1, b1, w2, s2, b2, w3, s3, b3 = params
    N, Cin, H, W = x_nchw.shape
    width = w1.shape[1]
    Cout = w3.shape[1]
    assert Cin == Cout, "downsample=None requires inplanes == planes * expansion"
    # TODO(synk): stride>1 / downsample / groups>1 paths are not implemented.

    # Fold BN scales into the conv output channels, pre-reshape w2 to im2col
    # layout (rows ordered (dy, dx, ci) to match the kernel's tap order), and
    # cast weights to bf16 for the MXU.
    w1f = (w1 * s1.reshape(1, -1)).astype(jnp.bfloat16)                       # (Cin, width)
    w2f = (w2 * s2.reshape(1, 1, 1, -1)).reshape(9 * width, width)
    w2f = w2f.astype(jnp.bfloat16)                                            # (9*width, width)
    w3f = (w3 * s3.reshape(1, -1)).astype(jnp.bfloat16)                       # (width, Cout)
    b1f = b1.reshape(1, width).astype(jnp.float32)
    b2f = b2.reshape(1, width).astype(jnp.float32)
    b3f = b3.reshape(1, Cout).astype(jnp.float32)

    x_nhwc = jnp.transpose(x_nchw, (0, 2, 3, 1))  # NCHW -> NHWC

    zero2 = lambda n: (0, 0)
    out_nhwc = pl.pallas_call(
        _bottleneck_kernel,
        out_shape=jax.ShapeDtypeStruct((N, H, W, Cout), x_nhwc.dtype),
        grid_spec=pltpu.PrefetchScalarGridSpec(
            num_scalar_prefetch=0,
            grid=(N,),
            in_specs=[
                pl.BlockSpec((1, H, W, Cin), lambda n: (n, 0, 0, 0)),
                pl.BlockSpec((Cin, width), zero2),
                pl.BlockSpec((1, width), zero2),
                pl.BlockSpec((9 * width, width), zero2),
                pl.BlockSpec((1, width), zero2),
                pl.BlockSpec((width, Cout), zero2),
                pl.BlockSpec((1, Cout), zero2),
            ],
            out_specs=pl.BlockSpec((1, H, W, Cout), lambda n: (n, 0, 0, 0)),
            scratch_shapes=[
                pltpu.VMEM((H + 2, W + 2, width), jnp.float32),
                pltpu.VMEM((H, W, 9 * width), jnp.float32),
            ],
        ),
        compiler_params=pltpu.CompilerParams(
            dimension_semantics=("parallel",),
            vmem_limit_bytes=_vmem_limit_bytes(H, W, Cin, Cout, width)),
    )(x_nhwc, w1f, b1f, w2f, b2f, w3f, b3f)

    return jnp.transpose(out_nhwc, (0, 3, 1, 2))  # NHWC -> NCHW


# ---------------- parameter construction (deterministic, in-script) -----------

def _fold_bn(gamma, beta, mean, var, eps=1e-5):
    scale = gamma / jnp.sqrt(var + eps)
    bias = beta - mean * scale
    return scale.reshape(1, -1), bias.reshape(1, -1)


def make_params(key, inplanes, planes, base_width=64, groups=1):
    width = int(planes * (base_width / 64.0)) * groups
    cout = planes * 4  # expansion
    ks = jax.random.split(key, 15)

    w1 = jax.random.normal(ks[0], (inplanes, width), jnp.float32) * 0.1
    w2 = jax.random.normal(ks[1], (3, 3, width, width), jnp.float32) * 0.1
    w3 = jax.random.normal(ks[2], (width, cout), jnp.float32) * 0.1

    def bn(k0, k1, k2, k3, c):
        gamma = 1.0 + 0.1 * jax.random.normal(k0, (c,), jnp.float32)
        beta = 0.1 * jax.random.normal(k1, (c,), jnp.float32)
        mean = 0.1 * jax.random.normal(k2, (c,), jnp.float32)
        var = jax.random.uniform(k3, (c,), jnp.float32, 0.5, 1.5)
        return _fold_bn(gamma, beta, mean, var)

    s1, b1 = bn(ks[3], ks[4], ks[5], ks[6], width)
    s2, b2 = bn(ks[7], ks[8], ks[9], ks[10], width)
    s3, b3 = bn(ks[11], ks[12], ks[13], ks[14], cout)
    return (w1, s1, b1, w2, s2, b2, w3, s3, b3)


# ---------------- pure-JAX reference (f32, for correctness check) -------------

def reference_forward(x_nchw, params):
    w1, s1, b1, w2, s2, b2, w3, s3, b3 = params
    x = jnp.transpose(x_nchw, (0, 2, 3, 1))  # NHWC
    dn = ('NHWC', 'HWIO', 'NHWC')
    conv = functools.partial(lax.conv_general_dilated, window_strides=(1, 1),
                             dimension_numbers=dn)
    h = conv(x, w1.reshape(1, 1, *w1.shape), padding='VALID')
    h = jnp.maximum(h * s1.reshape(-1) + b1.reshape(-1), 0.0)
    h = conv(h, w2, padding=((1, 1), (1, 1)))
    h = jnp.maximum(h * s2.reshape(-1) + b2.reshape(-1), 0.0)
    h = conv(h, w3.reshape(1, 1, *w3.shape), padding='VALID')
    h = h * s3.reshape(-1) + b3.reshape(-1)
    h = jnp.maximum(h + x, 0.0)
    return jnp.transpose(h, (0, 3, 1, 2))


if __name__ == "__main__":
    key = jax.random.PRNGKey(0)
    k_x, k_p = jax.random.split(key)

    # Bottleneck(inplanes=16, planes=4): width=4, out channels=16, stride=1.
    N, inplanes, planes, H, W = 2, 16, 4, 8, 8
    x = jax.random.normal(k_x, (N, inplanes, H, W), jnp.float32)
    params = make_params(k_p, inplanes, planes)

    out = bottleneck_forward(x, params)
    out = jax.block_until_ready(out)

    ref = reference_forward(x, params)
    assert out.shape == (N, planes * 4, H, W)
    # bf16 matmuls vs f32 reference -> loose-ish tolerance.
    assert jnp.allclose(out, ref, atol=5e-2, rtol=5e-2), \
        f"max abs err {jnp.max(jnp.abs(out - ref))}"

    print("KERNEL_OK")
</pallas_src>

<mosaic_0001>
module attributes {stable_mosaic.version = 11 : i64} {
  func.func @_bottleneck_kernel(%arg0: i32, %arg1: memref<1x8x8x16xf32, #tpu.memory_space<vmem>>, %arg2: memref<16x4xbf16, #tpu.memory_space<vmem>>, %arg3: memref<1x4xf32, #tpu.memory_space<vmem>>, %arg4: memref<36x4xbf16, #tpu.memory_space<vmem>>, %arg5: memref<1x4xf32, #tpu.memory_space<vmem>>, %arg6: memref<4x16xbf16, #tpu.memory_space<vmem>>, %arg7: memref<1x16xf32, #tpu.memory_space<vmem>>, %arg8: memref<1x8x8x16xf32, #tpu.memory_space<vmem>>, %arg9: memref<10x10x4xf32, #tpu.memory_space<vmem>>, %arg10: memref<8x8x36xf32, #tpu.memory_space<vmem>>) attributes {dimension_semantics = [#tpu.dimension_semantics<parallel>], iteration_bounds = array<i64: 2>, scalar_prefetch = 0 : i64, scratch_operands = 2 : i64, tpu.core_type = #tpu.core_type<tc>, window_params = [{transform_indices = @transform_0, window_bounds = array<i64: 1, 8, 8, 16>}, {pipeline_mode = #tpu.pipeline_mode<synchronous>, transform_indices = @transform_1, window_bounds = array<i64: 16, 4>}, {pipeline_mode = #tpu.pipeline_mode<synchronous>, transform_indices = @transform_2, window_bounds = array<i64: 1, 4>}, {pipeline_mode = #tpu.pipeline_mode<synchronous>, transform_indices = @transform_3, window_bounds = array<i64: 36, 4>}, {pipeline_mode = #tpu.pipeline_mode<synchronous>, transform_indices = @transform_4, window_bounds = array<i64: 1, 4>}, {pipeline_mode = #tpu.pipeline_mode<synchronous>, transform_indices = @transform_5, window_bounds = array<i64: 4, 16>}, {pipeline_mode = #tpu.pipeline_mode<synchronous>, transform_indices = @transform_6, window_bounds = array<i64: 1, 16>}, {transform_indices = @transform_7, window_bounds = array<i64: 1, 8, 8, 16>}]} {
    %c0 = arith.constant 0 : index
    %c0_0 = arith.constant 0 : index
    %c0_1 = arith.constant 0 : index
    %c0_2 = arith.constant 0 : index
    %0 = vector.load %arg1[%c0, %c0_0, %c0_1, %c0_2] : memref<1x8x8x16xf32, #tpu.memory_space<vmem>>, vector<1x8x8x16xf32>
    %1 = vector.shape_cast %0 : vector<1x8x8x16xf32> to vector<8x8x16xf32>
    %2 = vector.shape_cast %1 : vector<8x8x16xf32> to vector<64x16xf32>
    %3 = arith.truncf %2 : vector<64x16xf32> to vector<64x16xbf16>
    %c0_3 = arith.constant 0 : index
    %c0_4 = arith.constant 0 : index
    %4 = vector.load %arg2[%c0_3, %c0_4] : memref<16x4xbf16, #tpu.memory_space<vmem>>, vector<16x4xbf16>
    %cst = arith.constant dense<0.000000e+00> : vector<64x4xf32>
    %5 = tpu.matmul %3, %4, %cst {dimension_numbers = #tpu.dot_dimension_numbers<[1], [0], [0], [1], [0, 0, 1, 1], [], []>} : vector<64x16xbf16>, vector<16x4xbf16>, vector<64x4xf32> -> vector<64x4xf32>
    %c0_5 = arith.constant 0 : index
    %c0_6 = arith.constant 0 : index
    %6 = vector.load %arg3[%c0_5, %c0_6] : memref<1x4xf32, #tpu.memory_space<vmem>>, vector<1x4xf32>
    %7 = vector.broadcast %6 : vector<1x4xf32> to vector<64x4xf32>
    %8 = arith.addf %5, %7 : vector<64x4xf32>
    %cst_7 = arith.constant 0.000000e+00 : f32
    %9 = vector.broadcast %cst_7 : f32 to vector<64x4xf32>
    %10 = arith.maximumf %8, %9 : vector<64x4xf32>
    %cst_8 = arith.constant 0.000000e+00 : f32
    %11 = vector.broadcast %cst_8 : f32 to vector<1x10x4xf32>
    %c0_9 = arith.constant 0 : index
    %c0_10 = arith.constant 0 : index
    %c0_11 = arith.constant 0 : index
    %12 = vector.load %arg9[%c0_9, %c0_10, %c0_11] : memref<10x10x4xf32, #tpu.memory_space<vmem>>, vector<1x10x4xf32>
    tpu.vector_store %arg9[%c0_9, %c0_10, %c0_11], %11 {strides = array<i32>} : memref<10x10x4xf32, #tpu.memory_space<vmem>>, vector<1x10x4xf32>,
    %cst_12 = arith.constant 0.000000e+00 : f32
    %13 = vector.broadcast %cst_12 : f32 to vector<1x10x4xf32>
    %c9 = arith.constant 9 : index
    %c0_13 = arith.constant 0 : index
    %c0_14 = arith.constant 0 : index
    %14 = vector.load %arg9[%c9, %c0_13, %c0_14] : memref<10x10x4xf32, #tpu.memory_space<vmem>>, vector<1x10x4xf32>
    tpu.vector_store %arg9[%c9, %c0_13, %c0_14], %13 {strides = array<i32>} : memref<10x10x4xf32, #tpu.memory_space<vmem>>, vector<1x10x4xf32>,
    %cst_15 = arith.constant 0.000000e+00 : f32
    %15 = vector.broadcast %cst_15 : f32 to vector<10x1x4xf32>
    %c0_16 = arith.constant 0 : index
    %c0_17 = arith.constant 0 : index
    %c0_18 = arith.constant 0 : index
    %16 = vector.load %arg9[%c0_16, %c0_17, %c0_18] : memref<10x10x4xf32, #tpu.memory_space<vmem>>, vector<10x1x4xf32>
    tpu.vector_store %arg9[%c0_16, %c0_17, %c0_18], %15 {strides = array<i32>} : memref<10x10x4xf32, #tpu.memory_space<vmem>>, vector<10x1x4xf32>,
    %cst_19 = arith.constant 0.000000e+00 : f32
    %17 = vector.broadcast %cst_19 : f32 to vector<10x1x4xf32>
    %c0_20 = arith.constant 0 : index
    %c9_21 = arith.constant 9 : index
    %c0_22 = arith.constant 0 : index
    %18 = vector.load %arg9[%c0_20, %c9_21, %c0_22] : memref<10x10x4xf32, #tpu.memory_space<vmem>>, vector<10x1x4xf32>
    tpu.vector_store %arg9[%c0_20, %c9_21, %c0_22], %17 {strides = array<i32>} : memref<10x10x4xf32, #tpu.memory_space<vmem>>, vector<10x1x4xf32>,
    %19 = vector.shape_cast %10 : vector<64x4xf32> to vector<8x8x4xf32>
    %c1 = arith.constant 1 : index
    %c1_23 = arith.constant 1 : index
    %c0_24 = arith.constant 0 : index
    %20 = vector.load %arg9[%c1, %c1_23, %c0_24] : memref<10x10x4xf32, #tpu.memory_space<vmem>>, vector<8x8x4xf32>
    tpu.vector_store %arg9[%c1, %c1_23, %c0_24], %19 {strides = array<i32>} : memref<10x10x4xf32, #tpu.memory_space<vmem>>, vector<8x8x4xf32>,
    %c0_25 = arith.constant 0 : index
    %c0_26 = arith.constant 0 : index
    %c0_27 = arith.constant 0 : index
    %21 = vector.load %arg9[%c0_25, %c0_26, %c0_27] : memref<10x10x4xf32, #tpu.memory_space<vmem>>, vector<8x8x4xf32>
    %c0_28 = arith.constant 0 : index
    %c0_29 = arith.constant 0 : index
    %c0_30 = arith.constant 0 : index
    %22 = vector.load %arg10[%c0_28, %c0_29, %c0_30] : memref<8x8x36xf32, #tpu.memory_space<vmem>>, vector<8x8x4xf32>
    tpu.vector_store %arg10[%c0_28, %c0_29, %c0_30], %21 {strides = array<i32>} : memref<8x8x36xf32, #tpu.memory_space<vmem>>, vector<8x8x4xf32>,
    %c0_31 = arith.constant 0 : index
    %c1_32 = arith.constant 1 : index
    %c0_33 = arith.constant 0 : index
    %23 = vector.load %arg9[%c0_31, %c1_32, %c0_33] : memref<10x10x4xf32, #tpu.memory_space<vmem>>, vector<8x8x4xf32>
    %c0_34 = arith.constant 0 : index
    %c0_35 = arith.constant 0 : index
    %c4 = arith.constant 4 : index
    %24 = vector.load %arg10[%c0_34, %c0_35, %c4] : memref<8x8x36xf32, #tpu.memory_space<vmem>>, vector<8x8x4xf32>
    tpu.vector_store %arg10[%c0_34, %c0_35, %c4], %23 {strides = array<i32>} : memref<8x8x36xf32, #tpu.memory_space<vmem>>, vector<8x8x4xf32>,
    %c0_36 = arith.constant 0 : index
    %c2 = arith.constant 2 : index
    %c0_37 = arith.constant 0 : index
    %25 = vector.load %arg9[%c0_36, %c2, %c0_37] : memref<10x10x4xf32, #tpu.memory_space<vmem>>, vector<8x8x4xf32>
    %c0_38 = arith.constant 0 : index
    %c0_39 = arith.constant 0 : index
    %c8 = arith.constant 8 : index
    %26 = vector.load %arg10[%c0_38, %c0_39, %c8] : memref<8x8x36xf32, #tpu.memory_space<vmem>>, vector<8x8x4xf32>
    tpu.vector_store %arg10[%c0_38, %c0_39, %c8], %25 {strides = array<i32>} : memref<8x8x36xf32, #tpu.memory_space<vmem>>, vector<8x8x4xf32>,
    %c1_40 = arith.constant 1 : index
    %c0_41 = arith.constant 0 : index
    %c0_42 = arith.constant 0 : index
    %27 = vector.load %arg9[%c1_40, %c0_41, %c0_42] : memref<10x10x4xf32, #tpu.memory_space<vmem>>, vector<8x8x4xf32>
    %c0_43 = arith.constant 0 : index
    %c0_44 = arith.constant 0 : index
    %c12 = arith.constant 12 : index
    %28 = vector.load %arg10[%c0_43, %c0_44, %c12] : memref<8x8x36xf32, #tpu.memory_space<vmem>>, vector<8x8x4xf32>
    tpu.vector_store %arg10[%c0_43, %c0_44, %c12], %27 {strides = array<i32>} : memref<8x8x36xf32, #tpu.memory_space<vmem>>, vector<8x8x4xf32>,
    %c1_45 = arith.constant 1 : index
    %c1_46 = arith.constant 1 : index
    %c0_47 = arith.constant 0 : index
    %29 = vector.load %arg9[%c1_45, %c1_46, %c0_47] : memref<10x10x4xf32, #tpu.memory_space<vmem>>, vector<8x8x4xf32>
    %c0_48 = arith.constant 0 : index
    %c0_49 = arith.constant 0 : index
    %c16 = arith.constant 16 : index
    %30 = vector.load %arg10[%c0_48, %c0_49, %c16] : memref<8x8x36xf32, #tpu.memory_space<vmem>>, vector<8x8x4xf32>
    tpu.vector_store %arg10[%c0_48, %c0_49, %c16], %29 {strides = array<i32>} : memref<8x8x36xf32, #tpu.memory_space<vmem>>, vector<8x8x4xf32>,
    %c1_50 = arith.constant 1 : index
    %c2_51 = arith.constant 2 : index
    %c0_52 = arith.constant 0 : index
    %31 = vector.load %arg9[%c1_50, %c2_51, %c0_52] : memref<10x10x4xf32, #tpu.memory_space<vmem>>, vector<8x8x4xf32>
    %c0_53 = arith.constant 0 : index
    %c0_54 = arith.constant 0 : index
    %c20 = arith.constant 20 : index
    %32 = vector.load %arg10[%c0_53, %c0_54, %c20] : memref<8x8x36xf32, #tpu.memory_space<vmem>>, vector<8x8x4xf32>
    tpu.vector_store %arg10[%c0_53, %c0_54, %c20], %31 {strides = array<i32>} : memref<8x8x36xf32, #tpu.memory_space<vmem>>, vector<8x8x4xf32>,
    %c2_55 = arith.constant 2 : index
    %c0_56 = arith.constant 0 : index
    %c0_57 = arith.constant 0 : index
    %33 = vector.load %arg9[%c2_55, %c0_56, %c0_57] : memref<10x10x4xf32, #tpu.memory_space<vmem>>, vector<8x8x4xf32>
    %c0_58 = arith.constant 0 : index
    %c0_59 = arith.constant 0 : index
    %c24 = arith.constant 24 : index
    %34 = vector.load %arg10[%c0_58, %c0_59, %c24] : memref<8x8x36xf32, #tpu.memory_space<vmem>>, vector<8x8x4xf32>
    tpu.vector_store %arg10[%c0_58, %c0_59, %c24], %33 {strides = array<i32>} : memref<8x8x36xf32, #tpu.memory_space<vmem>>, vector<8x8x4xf32>,
    %c2_60 = arith.constant 2 : index
    %c1_61 = arith.constant 1 : index
    %c0_62 = arith.constant 0 : index
    %35 = vector.load %arg9[%c2_60, %c1_61, %c0_62] : memref<10x10x4xf32, #tpu.memory_space<vmem>>, vector<8x8x4xf32>
    %c0_63 = arith.constant 0 : index
    %c0_64 = arith.constant 0 : index
    %c28 = arith.constant 28 : index
    %36 = vector.load %arg10[%c0_63, %c0_64, %c28] : memref<8x8x36xf32, #tpu.memory_space<vmem>>, vector<8x8x4xf32>
    tpu.vector_store %arg10[%c0_63, %c0_64, %c28], %35 {strides = array<i32>} : memref<8x8x36xf32, #tpu.memory_space<vmem>>, vector<8x8x4xf32>,
    %c2_65 = arith.constant 2 : index
    %c2_66 = arith.constant 2 : index
    %c0_67 = arith.constant 0 : index
    %37 = vector.load %arg9[%c2_65, %c2_66, %c0_67] : memref<10x10x4xf32, #tpu.memory_space<vmem>>, vector<8x8x4xf32>
    %c0_68 = arith.constant 0 : index
    %c0_69 = arith.constant 0 : index
    %c32 = arith.constant 32 : index
    %38 = vector.load %arg10[%c0_68, %c0_69, %c32] : memref<8x8x36xf32, #tpu.memory_space<vmem>>, vector<8x8x4xf32>
    tpu.vector_store %arg10[%c0_68, %c0_69, %c32], %37 {strides = array<i32>} : memref<8x8x36xf32, #tpu.memory_space<vmem>>, vector<8x8x4xf32>,
    %c0_70 = arith.constant 0 : index
    %c0_71 = arith.constant 0 : index
    %c0_72 = arith.constant 0 : index
    %39 = vector.load %arg10[%c0_70, %c0_71, %c0_72] : memref<8x8x36xf32, #tpu.memory_space<vmem>>, vector<8x8x36xf32>
    %40 = vector.shape_cast %39 : vector<8x8x36xf32> to vector<64x36xf32>
    %41 = arith.truncf %40 : vector<64x36xf32> to vector<64x36xbf16>
    %c0_73 = arith.constant 0 : index
    %c0_74 = arith.constant 0 : index
    %42 = vector.load %arg4[%c0_73, %c0_74] : memref<36x4xbf16, #tpu.memory_space<vmem>>, vector<36x4xbf16>
    %cst_75 = arith.constant dense<0.000000e+00> : vector<64x4xf32>
    %43 = tpu.matmul %41, %42, %cst_75 {dimension_numbers = #tpu.dot_dimension_numbers<[1], [0], [0], [1], [0, 0, 1, 1], [], []>} : vector<64x36xbf16>, vector<36x4xbf16>, vector<64x4xf32> -> vector<64x4xf32>
    %c0_76 = arith.constant 0 : index
    %c0_77 = arith.constant 0 : index
    %44 = vector.load %arg5[%c0_76, %c0_77] : memref<1x4xf32, #tpu.memory_space<vmem>>, vector<1x4xf32>
    %45 = vector.broadcast %44 : vector<1x4xf32> to vector<64x4xf32>
    %46 = arith.addf %43, %45 : vector<64x4xf32>
    %cst_78 = arith.constant 0.000000e+00 : f32
    %47 = vector.broadcast %cst_78 : f32 to vector<64x4xf32>
    %48 = arith.maximumf %46, %47 : vector<64x4xf32>
    %49 = arith.truncf %48 : vector<64x4xf32> to vector<64x4xbf16>
    %c0_79 = arith.constant 0 : index
    %c0_80 = arith.constant 0 : index
    %50 = vector.load %arg6[%c0_79, %c0_80] : memref<4x16xbf16, #tpu.memory_space<vmem>>, vector<4x16xbf16>
    %cst_81 = arith.constant dense<0.000000e+00> : vector<64x16xf32>
    %51 = tpu.matmul %49, %50, %cst_81 {dimension_numbers = #tpu.dot_dimension_numbers<[1], [0], [0], [1], [0, 0, 1, 1], [], []>} : vector<64x4xbf16>, vector<4x16xbf16>, vector<64x16xf32> -> vector<64x16xf32>
    %c0_82 = arith.constant 0 : index
    %c0_83 = arith.constant 0 : index
    %52 = vector.load %arg7[%c0_82, %c0_83] : memref<1x16xf32, #tpu.memory_space<vmem>>, vector<1x16xf32>
    %53 = vector.broadcast %52 : vector<1x16xf32> to vector<64x16xf32>
    %54 = arith.addf %51, %53 : vector<64x16xf32>
    %c0_84 = arith.constant 0 : index
    %c0_85 = arith.constant 0 : index
    %c0_86 = arith.constant 0 : index
    %c0_87 = arith.constant 0 : index
    %55 = vector.load %arg1[%c0_84, %c0_85, %c0_86, %c0_87] : memref<1x8x8x16xf32, #tpu.memory_space<vmem>>, vector<1x8x8x16xf32>
    %56 = vector.shape_cast %55 : vector<1x8x8x16xf32> to vector<8x8x16xf32>
    %57 = vector.shape_cast %56 : vector<8x8x16xf32> to vector<64x16xf32>
    %58 = arith.addf %54, %57 : vector<64x16xf32>
    %cst_88 = arith.constant 0.000000e+00 : f32
    %59 = vector.broadcast %cst_88 : f32 to vector<64x16xf32>
    %60 = arith.maximumf %58, %59 : vector<64x16xf32>
    %61 = vector.shape_cast %60 : vector<64x16xf32> to vector<8x8x16xf32>
    %c0_89 = arith.constant 0 : index
    %c0_90 = arith.constant 0 : index
    %c0_91 = arith.constant 0 : index
    %c0_92 = arith.constant 0 : index
    %62 = vector.load %arg8[%c0_89, %c0_90, %c0_91, %c0_92] : memref<1x8x8x16xf32, #tpu.memory_space<vmem>>, vector<1x8x8x16xf32>
    %63 = vector.shape_cast %62 : vector<1x8x8x16xf32> to vector<8x8x16xf32>
    %64 = vector.shape_cast %61 : vector<8x8x16xf32> to vector<1x8x8x16xf32>
    tpu.vector_store %arg8[%c0_89, %c0_90, %c0_91, %c0_92], %64 {strides = array<i32>} : memref<1x8x8x16xf32, #tpu.memory_space<vmem>>, vector<1x8x8x16xf32>,
    return
  }
  func.func @transform_0(%arg0: i32) -> (i32, i32, i32, i32) {
    %c0_i32 = arith.constant 0 : i32
    %c0_i32_0 = arith.constant 0 : i32
    %c0_i32_1 = arith.constant 0 : i32
    %c0_i32_2 = arith.constant 0 : i32
    return %arg0, %c0_i32, %c0_i32_0, %c0_i32_1 : i32, i32, i32, i32
  }
  func.func @transform_1(%arg0: i32) -> (i32, i32) {
    %c0_i32 = arith.constant 0 : i32
    %c0_i32_0 = arith.constant 0 : i32
    %c0_i32_1 = arith.constant 0 : i32
    return %c0_i32, %c0_i32_0 : i32, i32
  }
  func.func @transform_2(%arg0: i32) -> (i32, i32) {
    %c0_i32 = arith.constant 0 : i32
    %c0_i32_0 = arith.constant 0 : i32
    %c0_i32_1 = arith.constant 0 : i32
    return %c0_i32, %c0_i32_0 : i32, i32
  }
  func.func @transform_3(%arg0: i32) -> (i32, i32) {
    %c0_i32 = arith.constant 0 : i32
    %c0_i32_0 = arith.constant 0 : i32
    %c0_i32_1 = arith.constant 0 : i32
    return %c0_i32, %c0_i32_0 : i32, i32
  }
  func.func @transform_4(%arg0: i32) -> (i32, i32) {
    %c0_i32 = arith.constant 0 : i32
    %c0_i32_0 = arith.constant 0 : i32
    %c0_i32_1 = arith.constant 0 : i32
    return %c0_i32, %c0_i32_0 : i32, i32
  }
  func.func @transform_5(%arg0: i32) -> (i32, i32) {
    %c0_i32 = arith.constant 0 : i32
    %c0_i32_0 = arith.constant 0 : i32
    %c0_i32_1 = arith.constant 0 : i32
    return %c0_i32, %c0_i32_0 : i32, i32
  }
  func.func @transform_6(%arg0: i32) -> (i32, i32) {
    %c0_i32 = arith.constant 0 : i32
    %c0_i32_0 = arith.constant 0 : i32
    %c0_i32_1 = arith.constant 0 : i32
    return %c0_i32, %c0_i32_0 : i32, i32
  }
  func.func @transform_7(%arg0: i32) -> (i32, i32, i32, i32) {
    %c0_i32 = arith.constant 0 : i32
    %c0_i32_0 = arith.constant 0 : i32
    %c0_i32_1 = arith.constant 0 : i32
    %c0_i32_2 = arith.constant 0 : i32
    return %arg0, %c0_i32, %c0_i32_0, %c0_i32_1 : i32, i32, i32, i32
  }
}

</mosaic_0001>

<bundles_post_ra>
// kernel: tpu_custom_call.1
= control target key start
LH: loop header
LB: loop body
LE: loop exit
PB: predicated region body
PF: predicated region fallthrough
CT: control target
= control target key end

     0   :  { %12 = vsyncpa [#allocation5], 0  ;;  %s1965_s0 = inlined_call_operand.hbm [shape: f32[2,8,8,16], index: 0, kind: input, shape index: {}]   ;;  %s1966_s1 = inlined_call_operand.vmem [shape: bf16[16,4], index: 1, kind: input, shape index: {}]   ;;  %s1967_s2 = inlined_call_operand.vmem [shape: f32[1,4], index: 2, kind: input, shape index: {}]   ;;  %s1968_s3 = inlined_call_operand.vmem [shape: bf16[36,4], index: 3, kind: input, shape index: {}]   ;;  %s1969_s4 = inlined_call_operand.vmem [shape: f32[1,4], index: 4, kind: input, shape index: {}]   ;;  %s1970_s5 = inlined_call_operand.vmem [shape: bf16[4,16], index: 5, kind: input, shape index: {}]   ;;  %s1971_s6 = inlined_call_operand.vmem [shape: f32[1,16], index: 6, kind: input, shape index: {}]   ;;  %s1972_s7 = inlined_call_operand.hbm [shape: f32[2,8,8,16], index: 7, kind: output, shape index: {}]  }
   0x1   :  { %14 = vsyncpa [#allocation5 + $0x1], 0 }
   0x2   :  { %15 = vsyncpa [#allocation6], 0 }
   0x3   :  { %17 = vsyncpa [#allocation6 + $0x1], 0  ;;  %s1497_s24 = smov 0   ;;  %s1499_s25 = smov 0  }
   0x4   :  { %s1501_s26 = smov 0   ;;  %s1503_s27 = smov 0  }
   0x5 LB: > { %s1518_s28 = sadd.s32 4294967295, %s1441_s27   ;;  %s1197_s29 = sadd.s32 4294967294, %s1441_s27   ;;  %s1441_s27 = sphi %s1503_s27, %s1987_s27   ;;  %s1437_s26 = sphi %s1501_s26, %s1986_s26   ;;  %s1433_s25 = sphi %s1499_s25, %s1985_s25   ;;  %s1429_s24 = sphi %s1497_s24, %s1984_s24  }
   0x6   : > { %s1522_s30 = sadd.s32 1, %s1441_s27   ;;  %s30_s8 = sadd.s32 1, %s1437_s26 }
   0x7   : > { %s27_s9 = ssub.s32 %s1441_s27, %s1522_s30  ;;  %p37_p0 = scmp.ne.s32.totalorder %s1437_s26, %s1433_s25 }
   0x8   : > { %p28_p1 = scmp.eq.s32.totalorder %s27_s9, 0  ;;  %p38_p2 = scmp.eq.s32.totalorder %s1441_s27, 0 }
   0x9   : > { %p43_p3 = scmp.ne.s32.totalorder %s1433_s25, %s1429_s24  ;;  %p44_p4 = scmp.eq.s32.totalorder %s1518_s28, 0 }
   0xa   : > { %s1534_s10 = scalar_select %p28_p1, %s1437_s26, %s30_s8  }
   0xb   : > { %p1536_p5 = por %p38_p2, %p37_p0  ;;  %p1540_p6 = por %p44_p4, %p43_p3 }
   0xc   : > { %p193_p7 = scmp.eq.s32.totalorder %s1518_s28, 1  ;;  %p199_p8 = scmp.eq.s32.totalorder %s1197_s29, 1 }
   0xd   : > { %s1976_s12 = scalar_select %p1540_p6, 1, 0 }
   0xe   : > { %p1299_p10 = scmp.lt.s32.totalorder %s1441_s27, 2  ;;  %p1547_p11 = por %p193_p7, %p37_p0 }
   0xf   : > { %p1551_p12 = por %p199_p8, %p43_p3  ;;  %s237_s15 = sand.u32 1, %s1437_s26  }
  0x10   : > { %s1977_s13 = scalar_select %p1547_p11, 1, 0 }
  0x11   : > { %s1978_s14 = scalar_select %p1551_p12, 1, 0 }
  0x12   : > { %s1230_s16 = sshll.u32 %s1441_s27, 10  ;;  %s1200_s17 = sshll.u32 %s237_s15, 6 }
  0x13   : > { %s1560_s20 = scalar_lea.hbm %s1965_s0, %s1230_s16  ;;  %s241_s21 = scalar_lea.vmem [#allocation4], %s1200_s17 }
  0x14   : > { %s248_s22 = sshll.u32 %s241_s21, 4  ;;  %p1564_p13 = pnand %p1299_p10, %p1536_p5  ;;  %s1568_s22 = int_to_ptr.vmem [resolvable:$true] %s248_s22 }
  0x15   : > { %s1570_s29 = scalar_lea.sflag [#allocation5], %s237_s15  ;;  %s1349_s8 = scalar_lea.hbm %s1560_s20, 1024 }
  0x16   : > { %p1350_p0 = scmp.ne.s32.totalorder %s1560_s20, %s1349_s8  ;;  %p1351_p1 = pneg %p1564_p13 }
  0x17   : > { %s1354_s17 = scalar_lea.hbm %s1965_s0, 2048  ;;  %p1355_p4 = scmp.lt.s32.totalorder %s1560_s20, %s1965_s0 }
  0x18   : > { %p1352_p2 = pnand %p1351_p1, %p1350_p0  ;;  %p1356_p5 = scmp.lt.s32.totalorder %s1354_s17, %s1349_s8 }
  0x1a   : > { %p1353_p3 = pneg %p1352_p2  ;;  %p1357_p7 = por %p1356_p5, %p1355_p4 }
  0x1c   : > { %p1358_p8 = pnand %p1357_p7, %p1353_p3 }
  0x1e   : > { %1361 = shalt.err (!%p1358_p8)
}
  0x1f   : > { %s1362_s15 = scalar_lea.vmem %s1568_s22, 1024  ;;  %s1443_s19 = smov [#allocation4]  }
  0x20   : > { %p1363_p10 = scmp.ne.s32.totalorder %s1568_s22, %s1362_s15  ;;  %s1367_s21 = sshll.u32 %s1443_s19, 4  ;;  %s1368_s21 = int_to_ptr.vmem [resolvable:$false] %s1367_s21 }
  0x21   : > { %s1369_s9 = scalar_lea.vmem %s1368_s21, 2048  ;;  %p1370_p2 = scmp.lt.s32.totalorder %s1568_s22, %s1368_s21 }
  0x22   : > { %p1365_p9 = pnand %p1363_p10, %p1351_p1  ;;  %p1371_p12 = scmp.lt.s32.totalorder %s1369_s9, %s1362_s15 }
  0x24   : > { %p1366_p0 = pneg %p1365_p9  ;;  %p1372_p11 = por %p1371_p12, %p1370_p2 }
  0x26   : > { %p1373_p6 = pnand %p1372_p11, %p1366_p0 }
  0x28   : > { %1376 = shalt.err (!%p1373_p6)
}
  0x29   : > { %s1444_s8 = smov 128   ;;  %s1445_s16 = smov 8  }
  0x2a   : > { %1294 = dma.hbm_to_vmem [thread:$0]  (!%p1564_p13), %s1560_s20, 1024, %s1568_s22, %s1570_s29, %s1444_s8, %s1444_s8, %s1445_s16  }
  0x2b   : > { %p1203_p9 = scmp.ge.s32.totalorder %s1441_s27, 1  ;;  %p256_p1 = scmp.lt.s32.totalorder %s1441_s27, 3 }
  0x2d   : > { %p257_p3 = pnand %p1203_p9, %p256_p1 }
  0x2e   : > { %s1594_s17 = sand.u32 (!%p257_p3), 1, %s1433_s25   ;;  %p1980_p6 = scmp.ne.s32.totalorder (!%p257_p3), %s1976_s12, 0 }
  0x2f   : > { %260 = sbr.rel (%p257_p3) target bundleno = 931 (0x3a3), region = 48  ;;  %s1204_s11 = sshll.u32 (!%p257_p3), %s1594_s17, 6 }
  0x30   : > { %s263_s18 = scalar_lea.sflag (!%p257_p3), [#allocation5], %s1594_s17  ;;  %s266_s15 = scalar_lea.vmem (!%p257_p3), [#allocation4], %s1204_s11 }
  0x34   : > { %1420 = dma.done.wait (%p1980_p6), %s263_s18, 1024  }
  0x35   : > { %1422 = vsyncadd (%p1980_p6), %s263_s18, 4294966272  ;;  %v1345_v0 = vld [vmem:[%s1966_s1] sm:$0xff]   ;;  %v1609_v2 = vld [vmem:[%s266_s15 + $0x8] sm:$0xff]  ;;  %vm325_vm0 = vcmask 130048   ;;  %vm411_vm1 = vcmask 31744   ;;  %vm413_vm2 = vcmask 25600  }
  0x36   : > { %v1607_v1 = vld [vmem:[%s266_s15] sm:$0xff]  ;;  %v1611_v3 = vld [vmem:[%s266_s15 + $0x10] sm:$0xff]  ;;  %1249 = vmatprep.subr.bf16.mxu0 %v1345_v0  ;;  %v1615_v5 = vld [vmem:[%s266_s15 + $0x18] sm:$0xff]  ;;  %1283 = vmatprep.subr.bf16.mxu1 %v1345_v0  ;;  %v1446_v13 = vmov 0.0   ;;  %vm418_vm3 = vcmask 24576   ;;  %s1447_s12 = smov 28  }
  0x37   : > { %v306_v4 = vpack.c.bf16 %v1609_v2, %v1607_v1  ;;  %v1617_v6 = vld [vmem:[%s266_s15 + $0x20] sm:$0xff]  ;;  %v1619_v7 = vld [vmem:[%s266_s15 + $0x28] sm:$0xff]  ;;  %1250 = vmatpush3.bf16.msra.mxu0 %v1345_v0  ;;  %v307_v8 = vpack.c.bf16 %v1615_v5, %v1611_v3  ;;  %1284 = vmatpush3.bf16.msra.mxu1 %v1345_v0  ;;  %v1625_v10 = vld [vmem:[%s266_s15 + $0x30] sm:$0xff]  ;;  %416 = vst.msk [vmem:[#allocation2 + $0x90] sm:$0xff] %vm411_vm1, %v1446_v13  ;;  %s1448_s23 = smov 4   ;;  %s1449_s29 = smov 24  }
  0x38   : > { %v308_v9 = vpack.c.bf16 %v1619_v7, %v1617_v6  ;;  %v1627_v11 = vld [vmem:[%s266_s15 + $0x38] sm:$0xff]  ;;  %417 = vst.msk [vmem:[#allocation2 + $0x98] sm:$0x3] %vm413_vm2, %v1446_v13  ;;  %414 = vst.msk [vmem:[#allocation2 + $0x8] sm:$0x3] %vm413_vm2, %v1446_v13  ;;  %s1450_s19 = smov 8  }
  0x39   : > { %1251 = vmatprep.mubr.msk.bf16.mxu0 %vm325_vm0, %v306_v4  ;;  %v309_v12 = vpack.c.bf16 %v1627_v11, %v1625_v10  ;;  %412 = vst.msk [vmem:[#allocation2] sm:$0xff] %vm411_vm1, %v1446_v13  ;;  %vm504_vm4 = vcmask 64544   ;;  %vm553_vm5 = vcmask 97344   ;;  %v1206_v21 = vld [vmem:[%s1967_s2] ss:$0 sm:$0xff]  ;;  %s1451_s8 = smov 12  }
  0x3a   : > { %1255 = vmatprep.mubr.msk.bf16.mxu1 %vm325_vm0, %v308_v9  ;;  %1252 = vmatmul.mubr.msk.bf16.vlgmr.msra.gmra.mxu0 %vm325_vm0, %v307_v8  ;;  %419 = vst.msk [vmem:[#allocation2] sm:$0x1] %vm418_vm3, %v1446_v13  ;;  %420 = vst.msk [vmem:[#allocation2 + $0x10] sm:$0x1] %vm418_vm3, %v1446_v13  ;;  %s1452_s16 = smov 16   ;;  %s1453_s18 = smov 20  }
  0x3b   : > { %1256 = vmatmul.mubr.msk.bf16.vlgmr.msra.gmra.mxu1 %vm325_vm0, %v309_v12  ;;  %421 = vst.msk [vmem:[#allocation2 + $0x20] sm:$0x1] %vm418_vm3, %v1446_v13  ;;  %422 = vst.msk [vmem:[#allocation2 + $0x30] sm:$0x1] %vm418_vm3, %v1446_v13  ;;  %s1454_s15 = smov 32   ;;  %vm909_vm6 = vcmask 1041408  }
  0x3c   : > { %423 = vst.msk [vmem:[#allocation2 + $0x40] sm:$0x1] %vm418_vm3, %v1446_v13  ;;  %424 = vst.msk [vmem:[#allocation2 + $0x50] sm:$0x1] %vm418_vm3, %v1446_v13  ;;  %vm602_vm7 = vcmask 130144   ;;  %vm651_vm8 = vcmask 162944  }
  0x3d   : > { %425 = vst.msk [vmem:[#allocation2 + $0x60] sm:$0x1] %vm418_vm3, %v1446_v13  ;;  %426 = vst.msk [vmem:[#allocation2 + $0x70] sm:$0x1] %vm418_vm3, %v1446_v13  ;;  %vm700_vm9 = vcmask 195744   ;;  %vm750_vm10 = vcmask 228544  }
  0x3e   : > { %427 = vst.msk [vmem:[#allocation2 + $0x80] sm:$0x1] %vm418_vm3, %v1446_v13  ;;  %428 = vst.msk [vmem:[#allocation2 + $0x90] sm:$0x1] %vm418_vm3, %v1446_v13  ;;  %vm799_vm11 = vcmask 261344   ;;  %vm848_vm12 = vcmask 294144  }
  0x3f   : > { %429 = vst.msk [vmem:[#allocation2 + $0x9] sm:$0x1] %vm418_vm3, %v1446_v13  ;;  %430 = vst.msk [vmem:[#allocation2 + $0x19] sm:$0x1] %vm418_vm3, %v1446_v13  ;;  %v766_v14 = vld [vmem:[#allocation2 + $0x91] sm:$0xff]  ;;  %vm896_vm13 = vcmask 293888  }
  0x40   : > { %431 = vst.msk [vmem:[#allocation2 + $0x29] sm:$0x1] %vm418_vm3, %v1446_v13  ;;  %432 = vst.msk [vmem:[#allocation2 + $0x39] sm:$0x1] %vm418_vm3, %v1446_v13  ;;  %v464_v15 = vld [vmem:[#allocation2 + $0x1] sm:$0xff]  ;;  %789 = vrot.lane.b32.xlu1 %v766_v14, %s1447_s12  ;;  %p1981_p12 = scmp.ne.s32.totalorder %s1977_s13, 0 }
  0x41   : > { %433 = vst.msk [vmem:[#allocation2 + $0x49] sm:$0x1] %vm418_vm3, %v1446_v13  ;;  %434 = vst.msk [vmem:[#allocation2 + $0x59] sm:$0x1] %vm418_vm3, %v1446_v13  ;;  %480 = vrot.lane.b32.xlu0 %v464_v15, %s1448_s23  ;;  %v448_v18 = vld [vmem:[#allocation2] sm:$0xff]  ;;  %v1347_v14 = vld [vmem:[%s1968_s3 + $0x8] sm:$0xff]  }
  0x42   : > { %435 = vst.msk [vmem:[#allocation2 + $0x69] sm:$0x1] %vm418_vm3, %v1446_v13  ;;  %436 = vst.msk [vmem:[#allocation2 + $0x79] sm:$0x1] %vm418_vm3, %v1446_v13 }
  0x43   : > { %437 = vst.msk [vmem:[#allocation2 + $0x89] sm:$0x1] %vm418_vm3, %v1446_v13  ;;  %438 = vst.msk [vmem:[#allocation2 + $0x99] sm:$0x1] %vm418_vm3, %v1446_v13 }
  0x44   : > { %456 = vst.msk [vmem:[#allocation3] sm:$0xff] %vm411_vm1, %v448_v18  ;;  %v1346_v12 = vld [vmem:[%s1968_s3 + $0x10] ss:$0 sps:$4 sm:$0x33]  }
  0x45   : > { %v717_v16 = vld [vmem:[#allocation2 + $0x90] sm:$0xff]  ;;  %1285 = vmatprep.subr.msk.bf16.mxu1 %vm909_vm6, %v1346_v12  ;;  %v911_v13 = vsel %vm909_vm6, %v1346_v12, 0 }
  0x46   : > { %v513_v17 = vld [vmem:[#allocation2 + $0x2] sm:$0xff]  ;;  %740 = vrot.lane.b32.xlu1 %v717_v16, %s1449_s29  ;;  %1260 = vmatpush3.bf16.msra.mxu1 %v911_v13 }
  0x47   : > { %529 = vrot.lane.b32.xlu0 %v513_v17, %s1450_s19  ;;  %1261 = vmatprep.subr.bf16.mxu1 %v1347_v14  ;;  %v1348_v16 = vld [vmem:[%s1968_s3] sm:$0xff]  }
  0x4a   : > { %1262 = vmatpush3.bf16.msra.mxu1 %v1347_v14 }
  0x4b   : > { %1263 = vmatprep.subr.bf16.mxu1 %v1348_v16 }
  0x4e   : > { %1264 = vmatpush3.bf16.msra.mxu1 %v1348_v16 }
  0xb2   : > { %v1753_v18 = vpop.permute.xlu1 %789 }
  0xb3   : > { %v481_v19 = vpop.permute.xlu0 %480 }
  0xb4   : > { %505 = vst.msk [vmem:[#allocation3] sm:$0xff] %vm504_vm4, %v481_v19 }
  0xb8   : > { %v1761_v19 = vpop.permute.xlu1 %740 }
  0xb9   : > { %v530_v20 = vpop.permute.xlu0 %529 }
  0xba   : > { %554 = vst.msk [vmem:[#allocation3] sm:$0xff] %vm553_vm5, %v530_v20  ;;  %v815_v20 = vld [vmem:[#allocation2 + $0x92] sm:$0xff] }
  0xfa   : > { %v1253_v22 = vpop.f32.mrf.mxu0 }
  0xfb   : > { %v1257_v23 = vpop.f32.mrf.mxu1  ;;  %v381_v24 = vadd.f32 %v1253_v22, %v1206_v21 }
  0xfc   : > { %v397_v25 = vadd.f32 %v1257_v23, %v1206_v21  ;;  %v372_v26 = vpop.f32.mrf.mxu0 }
  0xfd   : > { %v388_v27 = vpop.f32.mrf.mxu1  ;;  %v405_v28 = vmax.f32 %v381_v24, 0.0  ;;  %v373_v29 = vadd.f32 %v1206_v21, %v372_v26 }
  0xfe   : > { %v409_v30 = vmax.f32 %v397_v25, 0.0  ;;  %v389_v31 = vadd.f32 %v1206_v21, %v388_v27  ;;  %v1254_v32 = vpop.f32.mrf.mxu0 }
  0xff   : > { %v1258_v33 = vpop.f32.mrf.mxu1  ;;  %442 = vst.msk [vmem:[#allocation2 + $0x31] sm:$0xff] %vm411_vm1, %v405_v28  ;;  %v403_v34 = vmax.f32 %v373_v29, 0.0  ;;  %v384_v35 = vadd.f32 %v1254_v32, %v1206_v21 }
 0x100   : > { %446 = vst.msk [vmem:[#allocation2 + $0x71] sm:$0xff] %vm411_vm1, %v409_v30  ;;  %v407_v36 = vmax.f32 %v389_v31, 0.0  ;;  %v400_v37 = vadd.f32 %v1258_v33, %v1206_v21  ;;  %v375_v38 = vpop.f32.mrf.mxu0 }
 0x101   : > { %v391_v39 = vpop.f32.mrf.mxu1  ;;  %440 = vst.msk [vmem:[#allocation2 + $0x11] sm:$0xff] %vm411_vm1, %v403_v34  ;;  %v406_v40 = vmax.f32 %v384_v35, 0.0  ;;  %v376_v41 = vadd.f32 %v1206_v21, %v375_v38 }
 0x102   : > { %444 = vst.msk [vmem:[#allocation2 + $0x51] sm:$0xff] %vm411_vm1, %v407_v36  ;;  %v410_v42 = vmax.f32 %v400_v37, 0.0  ;;  %v392_v43 = vadd.f32 %v1206_v21, %v391_v39 }
 0x103   : > { %443 = vst.msk [vmem:[#allocation2 + $0x41] sm:$0xff] %vm411_vm1, %v406_v40  ;;  %v404_v44 = vmax.f32 %v376_v41, 0.0 }
 0x104   : > { %447 = vst.msk [vmem:[#allocation2 + $0x81] sm:$0xff] %vm411_vm1, %v410_v42  ;;  %v408_v45 = vmax.f32 %v392_v43, 0.0 }
 0x105   : > { %441 = vst.msk [vmem:[#allocation2 + $0x21] sm:$0xff] %vm411_vm1, %v404_v44 }
 0x106   : > { %445 = vst.msk [vmem:[#allocation2 + $0x61] sm:$0xff] %vm411_vm1, %v408_v45  ;;  %v564_v46 = vld [vmem:[#allocation2 + $0x30] sm:$0xff] }
 0x107   : > { %v467_v47 = vld [vmem:[#allocation2 + $0x31] sm:$0xff]  ;;  %582 = vrot.lane.b32.xlu0 %v564_v46, %s1451_s8  ;;  %459 = vst.msk [vmem:[#allocation3 + $0x18] sm:$0xff] %vm411_vm1, %v564_v46 }
 0x108   : > { %486 = vrot.lane.b32.xlu1 %v467_v47, %s1448_s23  ;;  %v568_v48 = vld [vmem:[#allocation2 + $0x70] sm:$0xff] }
 0x109   : > { %v562_v49 = vld [vmem:[#allocation2 + $0x10] sm:$0xff]  ;;  %463 = vst.msk [vmem:[#allocation3 + $0x38] sm:$0xff] %vm411_vm1, %v568_v48 }
 0x10a   : > { %v566_v50 = vld [vmem:[#allocation2 + $0x50] sm:$0xff]  ;;  %457 = vst.msk [vmem:[#allocation3 + $0x8] sm:$0xff] %vm411_vm1, %v562_v49  ;;  %v712_v52 = vld [vmem:[#allocation2 + $0x40] sm:$0xff] }
 0x10b   : > { %v516_v51 = vld [vmem:[#allocation2 + $0x32] sm:$0xff]  ;;  %461 = vst.msk [vmem:[#allocation3 + $0x28] sm:$0xff] %vm411_vm1, %v566_v50  ;;  %631 = vrot.lane.b32.xlu0 %v467_v47, %s1452_s16  ;;  %460 = vst.msk [vmem:[#allocation3 + $0x20] sm:$0xff] %vm411_vm1, %v712_v52  ;;  %v761_v61 = vld [vmem:[#allocation2 + $0x41] sm:$0xff] }
 0x10c   : > { %535 = vrot.lane.b32.xlu1 %v516_v51, %s1450_s19  ;;  %v1684_v53 = vld [vmem:[#allocation2 + $0x20] sm:$0xff]  ;;  %v617_v55 = vld [vmem:[#allocation2 + $0x71] sm:$0xff] }
 0x10d   : > { %v1686_v54 = vld [vmem:[#allocation2 + $0x60] sm:$0xff]  ;;  %458 = vst.msk [vmem:[#allocation3 + $0x10] sm:$0xff] %vm411_vm1, %v1684_v53  ;;  %v666_v56 = vld [vmem:[#allocation2 + $0x72] sm:$0xff] }
 0x10e   : > { %462 = vst.msk [vmem:[#allocation3 + $0x30] sm:$0xff] %vm411_vm1, %v1686_v54  ;;  %v465_v57 = vld [vmem:[#allocation2 + $0x11] sm:$0xff]  ;;  %v810_v62 = vld [vmem:[#allocation2 + $0x42] sm:$0xff] }
 0x10f   : > { %680 = vrot.lane.b32.xlu0 %v516_v51, %s1453_s18  ;;  %v660_v58 = vld [vmem:[#allocation2 + $0x12] sm:$0xff]  ;;  %v716_v63 = vld [vmem:[#allocation2 + $0x80] sm:$0xff] }
 0x110   : > { %728 = vrot.lane.b32.xlu1 %v564_v46, %s1449_s29  ;;  %v615_v59 = vld [vmem:[#allocation2 + $0x51] sm:$0xff]  ;;  %v765_v0 = vld [vmem:[#allocation2 + $0x81] sm:$0xff] }
 0x111   : > { %v664_v60 = vld [vmem:[#allocation2 + $0x52] sm:$0xff]  ;;  %v515_v4 = vld [vmem:[#allocation2 + $0x22] sm:$0xff] }
 0x112   : > { %v667_v8 = vld [vmem:[#allocation2 + $0x82] sm:$0xff] }
 0x113   : > { %590 = vrot.lane.b32.xlu0 %v568_v48, %s1451_s8  ;;  %v466_v9 = vld [vmem:[#allocation2 + $0x21] sm:$0xff] }
 0x114   : > { %777 = vrot.lane.b32.xlu1 %v467_v47, %s1447_s12  ;;  %v470_v15 = vld [vmem:[#allocation2 + $0x61] sm:$0xff] }
 0x115   : > { %v519_v17 = vld [vmem:[#allocation2 + $0x62] sm:$0xff] }
 0x117   : > { %639 = vrot.lane.b32.xlu0 %v617_v55, %s1452_s16 }
 0x118   : > { %826 = vrot.lane.b32.xlu1 %v516_v51, %s1454_s15 }
 0x11b   : > { %688 = vrot.lane.b32.xlu0 %v666_v56, %s1453_s18 }
 0x11c   : > { %494 = vrot.lane.b32.xlu1 %v617_v55, %s1448_s23 }
 0x11f   : > { %482 = vrot.lane.b32.xlu0 %v465_v57, %s1448_s23 }
 0x120   : > { %543 = vrot.lane.b32.xlu1 %v666_v56, %s1450_s19 }
 0x123   : > { %578 = vrot.lane.b32.xlu0 %v562_v49, %s1451_s8 }
 0x124   : > { %736 = vrot.lane.b32.xlu1 %v568_v48, %s1449_s29 }
 0x127   : > { %627 = vrot.lane.b32.xlu0 %v465_v57, %s1452_s16 }
 0x128   : > { %785 = vrot.lane.b32.xlu1 %v617_v55, %s1447_s12 }
 0x12b   : > { %676 = vrot.lane.b32.xlu0 %v660_v58, %s1453_s18 }
 0x12c   : > { %834 = vrot.lane.b32.xlu1 %v666_v56, %s1454_s15 }
 0x12f   : > { %586 = vrot.lane.b32.xlu0 %v566_v50, %s1451_s8 }
 0x130   : > { %531 = vrot.lane.b32.xlu1 %v660_v58, %s1450_s19 }
 0x133   : > { %635 = vrot.lane.b32.xlu0 %v615_v59, %s1452_s16 }
 0x134   : > { %732 = vrot.lane.b32.xlu1 %v566_v50, %s1449_s29 }
 0x137   : > { %684 = vrot.lane.b32.xlu0 %v664_v60, %s1453_s18 }
 0x138   : > { %781 = vrot.lane.b32.xlu1 %v615_v59, %s1447_s12 }
 0x13b   : > { %730 = vrot.lane.b32.xlu0 %v712_v52, %s1449_s29 }
 0x13c   : > { %490 = vrot.lane.b32.xlu1 %v615_v59, %s1448_s23 }
 0x13f   : > { %779 = vrot.lane.b32.xlu0 %v761_v61, %s1447_s12 }
 0x140   : > { %830 = vrot.lane.b32.xlu1 %v664_v60, %s1454_s15 }
 0x143   : > { %488 = vrot.lane.b32.xlu0 %v761_v61, %s1448_s23 }
 0x144   : > { %539 = vrot.lane.b32.xlu1 %v664_v60, %s1450_s19 }
 0x147   : > { %828 = vrot.lane.b32.xlu0 %v810_v62, %s1454_s15 }
 0x148   : > { %584 = vrot.lane.b32.xlu1 %v712_v52, %s1451_s8 }
 0x14b   : > { %537 = vrot.lane.b32.xlu0 %v810_v62, %s1450_s19 }
 0x14c   : > { %633 = vrot.lane.b32.xlu1 %v761_v61, %s1452_s16 }
 0x14f   : > { %738 = vrot.lane.b32.xlu0 %v716_v63, %s1449_s29 }
 0x150   : > { %682 = vrot.lane.b32.xlu1 %v810_v62, %s1453_s18 }
 0x153   : > { %787 = vrot.lane.b32.xlu0 %v765_v0, %s1447_s12 }
 0x154   : > { %592 = vrot.lane.b32.xlu1 %v716_v63, %s1451_s8 }
 0x157   : > { %533 = vrot.lane.b32.xlu0 %v515_v4, %s1450_s19 }
 0x158   : > { %641 = vrot.lane.b32.xlu1 %v765_v0, %s1452_s16 }
 0x15b   : > { %726 = vrot.lane.b32.xlu0 %v1684_v53, %s1449_s29 }
 0x15c   : > { %690 = vrot.lane.b32.xlu1 %v667_v8, %s1453_s18 }
 0x15f   : > { %775 = vrot.lane.b32.xlu0 %v466_v9, %s1447_s12 }
 0x160   : > { %484 = vrot.lane.b32.xlu1 %v466_v9, %s1448_s23 }
 0x163   : > { %824 = vrot.lane.b32.xlu0 %v515_v4, %s1454_s15 }
 0x164   : > { %580 = vrot.lane.b32.xlu1 %v1684_v53, %s1451_s8 }
 0x167   : > { %492 = vrot.lane.b32.xlu0 %v470_v15, %s1448_s23  ;;  %s1455_s23 = smov [#allocation7]  }
 0x168   : > { %629 = vrot.lane.b32.xlu1 %v466_v9, %s1452_s16 }
 0x16b   : > { %541 = vrot.lane.b32.xlu0 %v519_v17, %s1450_s19 }
 0x16c   : > { %678 = vrot.lane.b32.xlu1 %v515_v4, %s1453_s18 }
 0x16f   : > { %734 = vrot.lane.b32.xlu0 %v1686_v54, %s1449_s29  ;;  %s1381_s29 = sshll.u32 %s1455_s23, 4  ;;  %s1382_s29 = int_to_ptr.vmem [resolvable:$false] %s1381_s29 }
 0x170   : > { %588 = vrot.lane.b32.xlu1 %v1686_v54, %s1451_s8  ;;  %s1383_s8 = scalar_lea.vmem %s1382_s29, 2048 }
 0x173   : > { %783 = vrot.lane.b32.xlu0 %v470_v15, %s1447_s12 }
 0x174   : > { %637 = vrot.lane.b32.xlu1 %v470_v15, %s1452_s16 }
 0x177   : > { %832 = vrot.lane.b32.xlu0 %v519_v17, %s1454_s15 }
 0x178   : > { %686 = vrot.lane.b32.xlu1 %v519_v17, %s1453_s18 }
 0x179   : > { %v1765_v21 = vpop.permute.xlu0 %582 }
 0x17a   : > { %v487_v22 = vpop.permute.xlu1 %486 }
 0x17b   : > { %508 = vst.msk [vmem:[#allocation3 + $0x18] sm:$0xff] %vm504_vm4, %v487_v22  ;;  %836 = vrot.lane.b32.xlu0 %v667_v8, %s1454_s15 }
 0x17c   : > { %838 = vrot.lane.b32.xlu1 %v815_v20, %s1454_s15  ;;  %s1890_s15 = scalar_lea.vmem [#allocation7], %s1204_s11  ;;  %s1231_s11 = sshll.u32 %s1518_s28, 10 }
 0x17d   : > { %v1770_v23 = vpop.permute.xlu0 %631  ;;  %s1124_s21 = sshll.u32 %s1890_s15, 4  ;;  %s1915_s22 = scalar_lea.hbm %s1972_s7, %s1231_s11  ;;  %s1919_s21 = int_to_ptr.vmem [resolvable:$true] %s1124_s21 }
 0x17e   : > { %v536_v24 = vpop.permute.xlu1 %535  ;;  %s1111_s28 = scalar_lea.sflag [#allocation6], %s1594_s17  ;;  %s1377_s12 = scalar_lea.vmem %s1919_s21, 1024 }
 0x17f   : > { %557 = vst.msk [vmem:[#allocation3 + $0x18] sm:$0xff] %vm553_vm5, %v536_v24  ;;  %p1378_p11 = scmp.ne.s32.totalorder %s1919_s21, %s1377_s12  ;;  %p1384_p5 = scmp.lt.s32.totalorder %s1919_s21, %s1382_s29 }
 0x180   : > { %p1385_p7 = scmp.lt.s32.totalorder %s1383_s8, %s1377_s12 }
 0x181   : > { %v1773_v25 = vpop.permute.xlu0 %680  ;;  %p1379_p13 = pnand %p1378_p11, %p1981_p12 }
 0x182   : > { %v1775_v26 = vpop.permute.xlu1 %728  ;;  %p1386_p8 = por %p1385_p7, %p1384_p5 }
 0x183   : > { %p1380_p4 = pneg %p1379_p13 }
 0x185   : > { %v1777_v27 = vpop.permute.xlu0 %590  ;;  %p1387_p10 = pnand %p1386_p8, %p1380_p4 }
 0x186   : > { %v1779_v28 = vpop.permute.xlu1 %777 }
 0x189   : > { %v1781_v29 = vpop.permute.xlu0 %639 }
 0x18a   : > { %v1783_v30 = vpop.permute.xlu1 %826 }
 0x18d   : > { %v1785_v31 = vpop.permute.xlu0 %688 }
 0x18e   : > { %v495_v32 = vpop.permute.xlu1 %494 }
 0x18f   : > { %512 = vst.msk [vmem:[#allocation3 + $0x38] sm:$0xff] %vm504_vm4, %v495_v32 }
 0x191   : > { %v483_v34 = vpop.permute.xlu0 %482 }
 0x192   : > { %v544_v33 = vpop.permute.xlu1 %543  ;;  %506 = vst.msk [vmem:[#allocation3 + $0x8] sm:$0xff] %vm504_vm4, %v483_v34 }
 0x193   : > { %561 = vst.msk [vmem:[#allocation3 + $0x38] sm:$0xff] %vm553_vm5, %v544_v33 }
 0x195   : > { %v579_v36 = vpop.permute.xlu0 %578 }
 0x196   : > { %v1790_v35 = vpop.permute.xlu1 %736  ;;  %603 = vst.msk [vmem:[#allocation3] sm:$0xff] %vm602_vm7, %v579_v36 }
 0x199   : > { %v628_v38 = vpop.permute.xlu0 %627 }
 0x19a   : > { %v1793_v37 = vpop.permute.xlu1 %785  ;;  %652 = vst.msk [vmem:[#allocation3] sm:$0xff] %vm651_vm8, %v628_v38 }
 0x19d   : > { %v677_v40 = vpop.permute.xlu0 %676 }
 0x19e   : > { %v1796_v39 = vpop.permute.xlu1 %834  ;;  %701 = vst.msk [vmem:[#allocation3] sm:$0xff] %vm700_vm9, %v677_v40 }
 0x1a1   : > { %v587_v42 = vpop.permute.xlu0 %586 }
 0x1a2   : > { %v532_v41 = vpop.permute.xlu1 %531 }
 0x1a3   : > { %555 = vst.msk [vmem:[#allocation3 + $0x8] sm:$0xff] %vm553_vm5, %v532_v41  ;;  %v1212_v41 = vld [vmem:[%s1969_s4] ss:$0 sm:$0xff] }
 0x1a5   : > { %v636_v44 = vpop.permute.xlu0 %635 }
 0x1a6   : > { %v733_v43 = vpop.permute.xlu1 %732 }
 0x1a9   : > { %v685_v46 = vpop.permute.xlu0 %684 }
 0x1aa   : > { %v782_v45 = vpop.permute.xlu1 %781 }
 0x1ad   : > { %v731_v48 = vpop.permute.xlu0 %730 }
 0x1ae   : > { %v491_v47 = vpop.permute.xlu1 %490 }
 0x1af   : > { %510 = vst.msk [vmem:[#allocation3 + $0x28] sm:$0xff] %vm504_vm4, %v491_v47 }
 0x1b1   : > { %v780_v50 = vpop.permute.xlu0 %779 }
 0x1b2   : > { %v831_v49 = vpop.permute.xlu1 %830 }
 0x1b5   : > { %v489_v52 = vpop.permute.xlu0 %488 }
 0x1b6   : > { %v540_v51 = vpop.permute.xlu1 %539  ;;  %509 = vst.msk [vmem:[#allocation3 + $0x20] sm:$0xff] %vm504_vm4, %v489_v52 }
 0x1b7   : > { %559 = vst.msk [vmem:[#allocation3 + $0x28] sm:$0xff] %vm553_vm5, %v540_v51 }
 0x1b9   : > { %v829_v54 = vpop.permute.xlu0 %828 }
 0x1ba   : > { %v585_v53 = vpop.permute.xlu1 %584 }
 0x1bb   : > { %606 = vst.msk [vmem:[#allocation3 + $0x18] sm:$0xff] %vm602_vm7, %v585_v53 }
 0x1bd   : > { %v538_v56 = vpop.permute.xlu0 %537 }
 0x1be   : > { %v634_v55 = vpop.permute.xlu1 %633  ;;  %558 = vst.msk [vmem:[#allocation3 + $0x20] sm:$0xff] %vm553_vm5, %v538_v56 }
 0x1bf   : > { %655 = vst.msk [vmem:[#allocation3 + $0x18] sm:$0xff] %vm651_vm8, %v634_v55 }
 0x1c0   : > { %607 = vst.msk [vmem:[#allocation3 + $0x20] sm:$0xff] %vm602_vm7, %v587_v42 }
 0x1c1   : > { %656 = vst.msk [vmem:[#allocation3 + $0x20] sm:$0xff] %vm651_vm8, %v636_v44  ;;  %v739_v58 = vpop.permute.xlu0 %738 }
 0x1c2   : > { %v683_v57 = vpop.permute.xlu1 %682  ;;  %705 = vst.msk [vmem:[#allocation3 + $0x20] sm:$0xff] %vm700_vm9, %v685_v46 }
 0x1c3   : > { %704 = vst.msk [vmem:[#allocation3 + $0x18] sm:$0xff] %vm700_vm9, %v683_v57 }
 0x1c4   : > { %754 = vst.msk [vmem:[#allocation3 + $0x18] sm:$0xff] %vm750_vm10, %v733_v43 }
 0x1c5   : > { %803 = vst.msk [vmem:[#allocation3 + $0x18] sm:$0xff] %vm799_vm11, %v782_v45  ;;  %v788_v60 = vpop.permute.xlu0 %787 }
 0x1c6   : > { %852 = vst.msk [vmem:[#allocation3 + $0x18] sm:$0xff] %vm848_vm12, %v831_v49  ;;  %v593_v59 = vpop.permute.xlu1 %592 }
 0x1c7   : > { %610 = vst.msk [vmem:[#allocation3 + $0x38] sm:$0xff] %vm602_vm7, %v593_v59 }
 0x1c9   : > { %v534_v62 = vpop.permute.xlu0 %533 }
 0x1ca   : > { %v642_v61 = vpop.permute.xlu1 %641 }
 0x1cb   : > { %659 = vst.msk [vmem:[#allocation3 + $0x38] sm:$0xff] %vm651_vm8, %v642_v61 }
 0x1cd   : > { %v727_v0 = vpop.permute.xlu0 %726 }
 0x1ce   : > { %v691_v63 = vpop.permute.xlu1 %690  ;;  %751 = vst.msk [vmem:[#allocation3] sm:$0xff] %vm750_vm10, %v727_v0 }
 0x1cf   : > { %708 = vst.msk [vmem:[#allocation3 + $0x38] sm:$0xff] %vm700_vm9, %v691_v63 }
 0x1d0   : > { %758 = vst.msk [vmem:[#allocation3 + $0x38] sm:$0xff] %vm750_vm10, %v1761_v19 }
 0x1d1   : > { %807 = vst.msk [vmem:[#allocation3 + $0x38] sm:$0xff] %vm799_vm11, %v1753_v18  ;;  %v776_v8 = vpop.permute.xlu0 %775 }
 0x1d2   : > { %v485_v4 = vpop.permute.xlu1 %484  ;;  %800 = vst.msk [vmem:[#allocation3] sm:$0xff] %vm799_vm11, %v776_v8 }
 0x1d3   : > { %507 = vst.msk [vmem:[#allocation3 + $0x10] sm:$0xff] %vm504_vm4, %v485_v4 }
 0x1d4   : > { %556 = vst.msk [vmem:[#allocation3 + $0x10] sm:$0xff] %vm553_vm5, %v534_v62 }
 0x1d5   : > { %605 = vst.msk [vmem:[#allocation3 + $0x10] sm:$0xff] %vm602_vm7, %v1765_v21  ;;  %v825_v12 = vpop.permute.xlu0 %824 }
 0x1d6   : > { %654 = vst.msk [vmem:[#allocation3 + $0x10] sm:$0xff] %vm651_vm8, %v1770_v23  ;;  %v581_v9 = vpop.permute.xlu1 %580 }
 0x1d7   : > { %703 = vst.msk [vmem:[#allocation3 + $0x10] sm:$0xff] %vm700_vm9, %v1773_v25 }
 0x1d8   : > { %604 = vst.msk [vmem:[#allocation3 + $0x8] sm:$0xff] %vm602_vm7, %v581_v9 }
 0x1d9   : > { %849 = vst.msk [vmem:[#allocation3] sm:$0xff] %vm848_vm12, %v825_v12  ;;  %v493_v14 = vpop.permute.xlu0 %492  ;;  %v1220_v12 = vld [vmem:[%s1971_s6] ss:$0 sm:$0xff] }
 0x1da   : > { %753 = vst.msk [vmem:[#allocation3 + $0x10] sm:$0xff] %vm750_vm10, %v731_v48  ;;  %v630_v13 = vpop.permute.xlu1 %629 }
 0x1db   : > { %802 = vst.msk [vmem:[#allocation3 + $0x10] sm:$0xff] %vm799_vm11, %v780_v50 }
 0x1dc   : > { %851 = vst.msk [vmem:[#allocation3 + $0x10] sm:$0xff] %vm848_vm12, %v829_v54 }
 0x1dd   : > { %653 = vst.msk [vmem:[#allocation3 + $0x8] sm:$0xff] %vm651_vm8, %v630_v13  ;;  %v542_v16 = vpop.permute.xlu0 %541 }
 0x1de   : > { %511 = vst.msk [vmem:[#allocation3 + $0x30] sm:$0xff] %vm504_vm4, %v493_v14  ;;  %v679_v15 = vpop.permute.xlu1 %678 }
 0x1df   : > { %702 = vst.msk [vmem:[#allocation3 + $0x8] sm:$0xff] %vm700_vm9, %v679_v15 }
 0x1e0   : > { %560 = vst.msk [vmem:[#allocation3 + $0x30] sm:$0xff] %vm553_vm5, %v542_v16  ;;  %v857_v22 = vld [vmem:[#allocation3] sm:$0xff] }
 0x1e1   : > { %752 = vst.msk [vmem:[#allocation3 + $0x8] sm:$0xff] %vm750_vm10, %v1775_v26  ;;  %v735_v18 = vpop.permute.xlu0 %734 }
 0x1e2   : > { %609 = vst.msk [vmem:[#allocation3 + $0x30] sm:$0xff] %vm602_vm7, %v1777_v27  ;;  %v589_v17 = vpop.permute.xlu1 %588  ;;  %v860_v27 = vld [vmem:[#allocation3 + $0x18] sm:$0xff] }
 0x1e3   : > { %801 = vst.msk [vmem:[#allocation3 + $0x8] sm:$0xff] %vm799_vm11, %v1779_v28  ;;  %v859_v21 = vld [vmem:[#allocation3 + $0x10] sm:$0xff] }
 0x1e4   : > { %658 = vst.msk [vmem:[#allocation3 + $0x30] sm:$0xff] %vm651_vm8, %v1781_v29  ;;  %v866_v28 = vpack.c.bf16 %v860_v27, %v859_v21 }
 0x1e5   : > { %850 = vst.msk [vmem:[#allocation3 + $0x8] sm:$0xff] %vm848_vm12, %v1783_v30  ;;  %v784_v20 = vpop.permute.xlu0 %783 }
 0x1e6   : > { %707 = vst.msk [vmem:[#allocation3 + $0x30] sm:$0xff] %vm700_vm9, %v1785_v31  ;;  %v638_v19 = vpop.permute.xlu1 %637 }
 0x1e7   : > { %757 = vst.msk [vmem:[#allocation3 + $0x30] sm:$0xff] %vm750_vm10, %v739_v58  ;;  %755 = vst.msk [vmem:[#allocation3 + $0x20] sm:$0xff] %vm750_vm10, %v735_v18 }
 0x1e8   : > { %608 = vst.msk [vmem:[#allocation3 + $0x28] sm:$0xff] %vm602_vm7, %v589_v17 }
 0x1e9   : > { %806 = vst.msk [vmem:[#allocation3 + $0x30] sm:$0xff] %vm799_vm11, %v788_v60  ;;  %804 = vst.msk [vmem:[#allocation3 + $0x20] sm:$0xff] %vm799_vm11, %v784_v20  ;;  %v833_v25 = vpop.permute.xlu0 %832 }
 0x1ea   : > { %657 = vst.msk [vmem:[#allocation3 + $0x28] sm:$0xff] %vm651_vm8, %v638_v19  ;;  %v687_v24 = vpop.permute.xlu1 %686 }
 0x1eb   : > { %706 = vst.msk [vmem:[#allocation3 + $0x28] sm:$0xff] %vm700_vm9, %v687_v24 }
 0x1ec   : > { %v858_v23 = vld [vmem:[#allocation3 + $0x8] sm:$0xff]  ;;  %853 = vst.msk [vmem:[#allocation3 + $0x20] sm:$0xff] %vm848_vm12, %v833_v25 }
 0x1ed   : > { %v865_v26 = vpack.c.bf16 %v858_v23, %v857_v22  ;;  %756 = vst.msk [vmem:[#allocation3 + $0x28] sm:$0xff] %vm750_vm10, %v1790_v35  ;;  %v837_v30 = vpop.permute.xlu0 %836 }
 0x1ee   : > { %805 = vst.msk [vmem:[#allocation3 + $0x28] sm:$0xff] %vm799_vm11, %v1793_v37  ;;  %v839_v29 = vpop.permute.xlu1 %838  ;;  %v990_v37 = vld [vmem:[%s1970_s5] sm:$0x3] }
 0x1ef   : > { %1265 = vmatprep.mubr.msk.bf16.mxu1 %vm896_vm13, %v865_v26  ;;  %854 = vst.msk [vmem:[#allocation3 + $0x28] sm:$0xff] %vm848_vm12, %v1796_v39  ;;  %856 = vst.msk [vmem:[#allocation3 + $0x38] sm:$0xff] %vm848_vm12, %v839_v29  ;;  %1286 = vmatprep.subr.msk.bf16.mxu0 %vm909_vm6, %v990_v37  ;;  %v1011_v38 = vsel %vm909_vm6, %v990_v37, 0 }
 0x1f0   : > { %1266 = vmatmul.mubr.msk.bf16.vlgmr.msra.gmra.mxu1 %vm896_vm13, %v866_v28  ;;  %855 = vst.msk [vmem:[#allocation3 + $0x30] sm:$0xff] %vm848_vm12, %v837_v30  ;;  %1274 = vmatpush3.bf16.msra.mxu0 %v1011_v38 }
 0x1f3   : > { %v861_v31 = vld [vmem:[#allocation3 + $0x20] sm:$0xff] }
 0x1f6   : > { %v862_v32 = vld [vmem:[#allocation3 + $0x28] sm:$0xff]  ;;  %v864_v35 = vld [vmem:[#allocation3 + $0x38] sm:$0xff] }
 0x1f7   : > { %v867_v33 = vpack.c.bf16 %v862_v32, %v861_v31  ;;  %v863_v34 = vld [vmem:[#allocation3 + $0x30] sm:$0xff] }
 0x1f8   : > { %v868_v36 = vpack.c.bf16 %v864_v35, %v863_v34 }
 0x1f9   : > { %1269 = vmatprep.mubr.msk.bf16.mxu1 %vm896_vm13, %v867_v33 }
 0x1fa   : > { %1270 = vmatmul.mubr.msk.bf16.gmra.mxu1 %vm896_vm13, %v868_v36 }
 0x2b0   : > { %v1267_v39 = vpop.f32.mrf.mxu1 }
 0x2b1   : > { %v956_v45 = vadd.f32 %v1267_v39, %v1212_v41 }
 0x2b2   : > { %v947_v40 = vpop.f32.mrf.mxu1 }
 0x2b3   : > { %v948_v43 = vadd.f32 %v1212_v41, %v947_v40  ;;  %v980_v51 = vmax.f32 %v956_v45, 0.0 }
 0x2b4   : > { %v1268_v42 = vpop.f32.mrf.mxu1 }
 0x2b5   : > { %v959_v44 = vadd.f32 %v1268_v42, %v1212_v41  ;;  %v978_v49 = vmax.f32 %v948_v43, 0.0 }
 0x2b6   : > { %v950_v46 = vpop.f32.mrf.mxu1 }
 0x2b7   : > { %v951_v47 = vadd.f32 %v1212_v41, %v950_v46  ;;  %v981_v48 = vmax.f32 %v959_v44, 0.0 }
 0x2b9   : > { %v979_v50 = vmax.f32 %v951_v47, 0.0  ;;  %v987_v53 = vpack.c.bf16 %v981_v48, %v980_v51 }
 0x2ba   : > { %v1271_v54 = vpop.f32.mrf.mxu1 }
 0x2bb   : > { %v986_v52 = vpack.c.bf16 %v979_v50, %v978_v49  ;;  %v972_v59 = vadd.f32 %v1271_v54, %v1212_v41 }
 0x2bc   : > { %v963_v55 = vpop.f32.mrf.mxu1 }
 0x2bd   : > { %1275 = vmatprep.mubr.msk.bf16.mxu0 %vm411_vm1, %v986_v52  ;;  %v964_v57 = vadd.f32 %v1212_v41, %v963_v55  ;;  %v984_v4 = vmax.f32 %v972_v59, 0.0 }
 0x2be   : > { %1276 = vmatmul.mubr.msk.bf16.vlgmr.msra.gmra.mxu0 %vm411_vm1, %v987_v53  ;;  %v1272_v56 = vpop.f32.mrf.mxu1 }
 0x2bf   : > { %v975_v58 = vadd.f32 %v1272_v56, %v1212_v41  ;;  %v982_v63 = vmax.f32 %v964_v57, 0.0 }
 0x2c0   : > { %v966_v60 = vpop.f32.mrf.mxu1 }
 0x2c1   : > { %v967_v61 = vadd.f32 %v1212_v41, %v966_v60  ;;  %v985_v62 = vmax.f32 %v975_v58, 0.0 }
 0x2c3   : > { %v983_v0 = vmax.f32 %v967_v61, 0.0  ;;  %v989_v9 = vpack.c.bf16 %v985_v62, %v984_v4 }
 0x2c5   : > { %v988_v8 = vpack.c.bf16 %v983_v0, %v982_v63 }
 0x2c7   : > { %1279 = vmatprep.mubr.msk.bf16.mxu0 %vm411_vm1, %v988_v8 }
 0x2c8   : > { %1280 = vmatmul.mubr.msk.bf16.gmra.mxu0 %vm411_vm1, %v989_v9 }
 0x37e   : > { %v1277_v13 = vpop.f32.mrf.mxu0 }
 0x37f   : > { %v1056_v14 = vadd.f32 %v1277_v13, %v1220_v12 }
 0x380   : > { %v1047_v15 = vpop.f32.mrf.mxu0 }
 0x381   : > { %v1088_v16 = vadd.f32 %v1056_v14, %v1611_v3  ;;  %v1048_v17 = vadd.f32 %v1220_v12, %v1047_v15 }
 0x382   : > { %v1278_v18 = vpop.f32.mrf.mxu0 }
 0x383   : > { %v1096_v19 = vmax.f32 %v1088_v16, 0.0  ;;  %v1086_v20 = vadd.f32 %v1048_v17, %v1607_v1  ;;  %v1059_v21 = vadd.f32 %v1278_v18, %v1220_v12 }
 0x384   : > { %v1050_v22 = vpop.f32.mrf.mxu0 }
 0x385   : > { %1104 = vst.msk [vmem:[%s1890_s15 + $0x10] sm:$0xff] %vm325_vm0, %v1096_v19  ;;  %v1094_v23 = vmax.f32 %v1086_v20, 0.0  ;;  %v1089_v24 = vadd.f32 %v1059_v21, %v1615_v5  ;;  %v1051_v3 = vadd.f32 %v1220_v12, %v1050_v22 }
 0x387   : > { %1102 = vst.msk [vmem:[%s1890_s15] sm:$0xff] %vm325_vm0, %v1094_v23  ;;  %v1097_v25 = vmax.f32 %v1089_v24, 0.0  ;;  %v1087_v1 = vadd.f32 %v1051_v3, %v1609_v2 }
 0x388   : > { %v1281_v27 = vpop.f32.mrf.mxu0 }
 0x389   : > { %1105 = vst.msk [vmem:[%s1890_s15 + $0x18] sm:$0xff] %vm325_vm0, %v1097_v25  ;;  %v1095_v26 = vmax.f32 %v1087_v1, 0.0  ;;  %v1072_v28 = vadd.f32 %v1281_v27, %v1220_v12 }
 0x38a   : > { %v1063_v29 = vpop.f32.mrf.mxu0 }
 0x38b   : > { %1103 = vst.msk [vmem:[%s1890_s15 + $0x8] sm:$0xff] %vm325_vm0, %v1095_v26  ;;  %v1092_v5 = vadd.f32 %v1072_v28, %v1625_v10  ;;  %v1064_v30 = vadd.f32 %v1220_v12, %v1063_v29 }
 0x38c   : > { %v1282_v31 = vpop.f32.mrf.mxu0 }
 0x38d   : > { %v1100_v32 = vmax.f32 %v1092_v5, 0.0  ;;  %v1090_v33 = vadd.f32 %v1064_v30, %v1617_v6  ;;  %v1075_v2 = vadd.f32 %v1282_v31, %v1220_v12 }
 0x38e   : > { %v1066_v34 = vpop.f32.mrf.mxu0 }
 0x38f   : > { %1108 = vst.msk [vmem:[%s1890_s15 + $0x30] sm:$0xff] %vm325_vm0, %v1100_v32  ;;  %v1098_v35 = vmax.f32 %v1090_v33, 0.0  ;;  %v1093_v36 = vadd.f32 %v1075_v2, %v1627_v11  ;;  %v1067_v37 = vadd.f32 %v1220_v12, %v1066_v34 }
 0x391   : > { %1106 = vst.msk [vmem:[%s1890_s15 + $0x20] sm:$0xff] %vm325_vm0, %v1098_v35  ;;  %v1101_v10 = vmax.f32 %v1093_v36, 0.0  ;;  %v1091_v38 = vadd.f32 %v1067_v37, %v1619_v7 }
 0x393   : > { %1109 = vst.msk [vmem:[%s1890_s15 + $0x38] sm:$0xff] %vm325_vm0, %v1101_v10  ;;  %v1099_v6 = vmax.f32 %v1091_v38, 0.0 }
 0x395   : > { %1107 = vst.msk [vmem:[%s1890_s15 + $0x28] sm:$0xff] %vm325_vm0, %v1099_v6 }
 0x396   : > { %1390 = shalt.err (!%p1387_p10)
}
 0x397   : > { %s1391_s16 = scalar_lea.hbm %s1915_s22, 1024  ;;  %s1395_s11 = scalar_lea.hbm %s1972_s7, 2048 }
 0x398   : > { %p1392_p0 = scmp.ne.s32.totalorder %s1915_s22, %s1391_s16  ;;  %p1396_p1 = scmp.lt.s32.totalorder %s1915_s22, %s1972_s7 }
 0x399   : > { %p1397_p3 = scmp.lt.s32.totalorder %s1395_s11, %s1391_s16 }
 0x39a   : > { %p1393_p2 = pnand %p1392_p0, %p1981_p12 }
 0x39b   : > { %p1398_p6 = por %p1397_p3, %p1396_p1 }
 0x39c   : > { %p1394_p9 = pneg %p1393_p2 }
 0x39e   : > { %p1399_p11 = pnand %p1398_p6, %p1394_p9 }
 0x3a0   : > { %1402 = shalt.err (!%p1399_p11)
}
 0x3a1   : > { %s1456_s12 = smov 128  }
 0x3a2   : > { %1289 = dma.vmem_to_hbm [thread:$0]  (%p1981_p12), %s1919_s21, 1024, %s1915_s22, %s1111_s28, %s1456_s12, %s1456_s12, %s1450_s19  }
 0x3a3 PF: > { %s1139_s23 = sand.u32 1, %s1429_s24   ;;  %p1982_p13 = scmp.ne.s32.totalorder %s1978_s14, 0 }
 0x3a4   : > { %p1983_p4 = scmp.ge.s32.totalorder %s1441_s27, 2  ;;  %s1140_s29 = scalar_lea.sflag [#allocation6], %s1139_s23 }
 0x3a6   : > { %p1296_p5 = pnand %p1983_p4, %p1982_p13 }
 0x3a8   : > { %p1297_p7 = pneg %p1296_p5 }
 0x3aa   : > { %1424 = dma.done.wait (%p1297_p7), %s1140_s29, 1024  }
 0x3ab   : > { %1426 = vsyncadd (%p1297_p7), %s1140_s29, 4294966272  ;;  %p20_p8 = scmp.ge.s32.totalorder %s1522_s30, 4   ;;  %s1984_s24 = smov %s1433_s25 }
 0x3ac   : > { %s1985_s25 = smov %s1437_s26  ;;  %s1986_s26 = smov %s1534_s10 }
 0x3ad   : > { %s1987_s27 = smov %s1522_s30  ;;  %22 = sbr.rel (!%p20_p8) target bundleno = 5 (0x5), region = 96 }
 0x3b2   :  { %1145 = vsyncpa [#allocation5], 1 }
 0x3b3   :  { %1147 = vsyncpa [#allocation5 + $0x1], 1 }
 0x3b4   :  { %1148 = vsyncpa [#allocation6], 1 }
 0x3b5   :  { %1150 = vsyncpa [#allocation6 + $0x1], 1 }

</bundles_post_ra>
